<compile_context>
chip_gen: v6e
topology: v6e:2x2x1
jax: 0.10.0
libtpu: 0.0.40
codegen_flags: <defaults>
</compile_context>

<pallas_src>
import functools

import jax
import jax.numpy as jnp
from jax import lax
from jax.experimental import pallas as pl
from jax.experimental.pallas import tpu as pltpu


def _nll_kernel(logp_ref, tgt_ref, mask_ref, num_ref, den_ref, acc_ref,
                *, n_rows, tile_v):
    i = pl.program_id(0)          # N-tile index ("parallel")
    j = pl.program_id(1)          # V-tile index ("arbitrary", reduction)

    @pl.when(j == 0)
    def _init():
        acc_ref[...] = jnp.zeros_like(acc_ref)

    logp = logp_ref[...]                                  # (TN, TV) native dtype
    # Fold the vocab-tile offset into the (TN, 1) target instead of adding it
    # to a full-tile iota: one small op instead of TN*TV adds.
    local_tgt = tgt_ref[...] - j * tile_v                 # (TN, 1) int32
    lane_ids = lax.broadcasted_iota(jnp.int32, logp.shape, 1)   # 0..TV-1
    # True select in the native dtype; padded lanes / rows never match a valid
    # target, and select does not propagate garbage/NaN from unselected lanes.
    hits = jnp.where(lane_ids == local_tgt, logp, jnp.zeros_like(logp))
    # At most one nonzero per row -> native-dtype lane reduce is exact; only
    # the (TN, 1) result is widened to f32.
    acc_ref[...] += jnp.sum(hits, axis=1, keepdims=True).astype(jnp.float32)

    @pl.when(j == pl.num_programs(1) - 1)
    def _finalize():
        tn = acc_ref.shape[0]
        m = mask_ref[...]                                 # (TN, 1) float32
        # Mask rows past the true N extent (partial last N-block).  Keep these
        # as true selects (NOT multiplies): padded rows may hold garbage/NaN.
        row_ids = i * tn + lax.broadcasted_iota(jnp.int32, (tn, 1), 0)
        valid = row_ids < n_rows
        num = jnp.sum(jnp.where(valid, -acc_ref[...] * m, jnp.float32(0.0)))
        den = jnp.sum(jnp.where(valid, m, jnp.float32(0.0)))
        num_ref[...] = jnp.full(num_ref.shape, num, jnp.float32)
        den_ref[...] = jnp.full(den_ref.shape, den, jnp.float32)


def _choose_tiles(n, v, dtype_bytes):
    """Pick (TN, TV).

    TV: full V if small, else a multiple of 128 (grid_v = cdiv(V, TV); the
    compare-gather makes padded vocab lanes inert).
    TN: sized so one log-prob block is ~8 MiB (good DMA/step-overhead ratio on
    all of v5e/v6e/v7x), multiple of the sublane packing, capped at 4096 to
    bound the lane-padded (TN, 1) side buffers, and capped so grid_n >= 2
    whenever possible (v7x dual-TensorCore split of the parallel axis).
    """
    sub = 8 if dtype_bytes >= 4 else (16 if dtype_bytes == 2 else 32)

    if v <= 4096:
        tv = v                       # full vocab dim (any size allowed)
    else:
        tv = 4096                    # multiple of 128; last block may be partial

    logp_block_bytes = 8 * 1024 * 1024
    tn = logp_block_bytes // max(1, tv * dtype_bytes)
    tn = max(sub, (tn // sub) * sub)
    tn = min(tn, 4096)

    # Keep at least two N-blocks so the "parallel" axis can split across cores.
    half = -(-n // 2)
    half = ((half + sub - 1) // sub) * sub
    tn = min(tn, max(sub, half))

    n_ceil = ((n + sub - 1) // sub) * sub
    tn = min(tn, max(sub, n_ceil))
    return tn, tv


def _vmem_plan_bytes(tn, tv, dtype_bytes):
    """Estimate VMEM use of the tile plan, including lane padding of the
    (TN, 1) target/mask input blocks and the (TN, 1) f32 accumulator scratch
    (each pads to 128 lanes in VMEM)."""
    logp = 2 * tn * tv * dtype_bytes          # double-buffered log-prob blocks
    side = 5 * tn * 128 * 4                   # tgt(x2) + mask(x2) + acc, lane-padded
    outs = 2 * 2 * 8 * 128 * 4                # two (1, 8, 128) f32 outputs, buffered
    return logp + side + outs


@jax.jit
def language_model_criterion(logprobs, target, mask):
    """JAX/Pallas equivalent of LanguageModelCriterion.forward.

    logprobs: (B, T, V) log-probabilities (any float dtype; streamed natively)
    target:   (B, T_tgt) integer target ids (T_tgt >= T; truncated to T)
    mask:     (B, T_mask) float mask (truncated to T)
    returns:  scalar float32 loss
    """
    B, T, V = logprobs.shape
    target = target[:, :T].astype(jnp.int32)
    mask = mask[:, :T].astype(jnp.float32)

    N = B * T
    logp2 = logprobs.reshape(N, V)            # native dtype, no upcast copy
    tgt2 = target.reshape(N, 1)
    m2 = mask.reshape(N, 1)

    dtype_bytes = jnp.dtype(logprobs.dtype).itemsize
    TN, TV = _choose_tiles(N, V, dtype_bytes)
    grid_n = pl.cdiv(N, TN)
    grid_v = pl.cdiv(V, TV)
    grid = (grid_n, grid_v)

    vmem_limit = min(48 * 1024 * 1024,
                     max(16 * 1024 * 1024,
                         _vmem_plan_bytes(TN, TV, dtype_bytes) + 8 * 1024 * 1024))

    kernel = functools.partial(_nll_kernel, n_rows=N, tile_v=TV)

    num_out, den_out = pl.pallas_call(
        kernel,
        out_shape=(
            jax.ShapeDtypeStruct((grid_n, 8, 128), jnp.float32),
            jax.ShapeDtypeStruct((grid_n, 8, 128), jnp.float32),
        ),
        grid_spec=pltpu.PrefetchScalarGridSpec(
            num_scalar_prefetch=0,
            grid=grid,
            in_specs=[
                pl.BlockSpec((TN, TV), lambda i, j: (i, j)),   # log-prob tile
                pl.BlockSpec((TN, 1), lambda i, j: (i, 0)),    # targets (once per i)
                pl.BlockSpec((TN, 1), lambda i, j: (i, 0)),    # mask    (once per i)
            ],
            out_specs=[
                pl.BlockSpec((1, 8, 128), lambda i, j: (i, 0, 0)),
                pl.BlockSpec((1, 8, 128), lambda i, j: (i, 0, 0)),
            ],
            scratch_shapes=[pltpu.VMEM((TN, 1), jnp.float32)],  # per-row picked acc
        ),
        compiler_params=pltpu.CompilerParams(
            dimension_semantics=("parallel", "arbitrary"),
            vmem_limit_bytes=vmem_limit),
        cost_estimate=pl.CostEstimate(
            flops=2 * N * V,
            transcendentals=0,
            bytes_accessed=N * V * dtype_bytes + 2 * N * 4
            + 2 * grid_n * 8 * 128 * 4),
    )(logp2, tgt2, m2)

    num_total = jnp.sum(num_out[:, 0, 0])
    den_total = jnp.sum(den_out[:, 0, 0])
    # Same divide-by-zero behavior as the PyTorch module if sum(mask) == 0.
    return num_total / den_total


def _reference(logprobs, target, mask):
    B, T, V = logprobs.shape
    target = target[:, :T].astype(jnp.int32)
    mask = mask[:, :T].astype(jnp.float32)
    picked = jnp.take_along_axis(logprobs.astype(jnp.float32),
                                 target[..., None], axis=2)[..., 0]
    return jnp.sum(-picked * mask) / jnp.sum(mask)


if __name__ == "__main__":
    key = jax.random.PRNGKey(0)
    k1, k2, k3 = jax.random.split(key, 3)

    B, T, V = 2, 8, 32
    T_extra = T + 3  # target/mask longer than T, exercising the truncation

    logits = jax.random.normal(k1, (B, T, V), dtype=jnp.float32)
    logprobs = jax.nn.log_softmax(logits, axis=-1)          # input[0]
    target = jax.random.randint(k2, (B, T_extra), 0, V, dtype=jnp.int32)
    mask = (jax.random.uniform(k3, (B, T_extra)) > 0.25).astype(jnp.float32)
    mask = mask.at[0, 0].set(1.0)  # ensure sum(mask) > 0 in the window

    # `input` in the PyTorch module is a tuple/list; forward uses input[0].
    inputs = (logprobs,)

    # float32 path
    loss = jax.block_until_ready(language_model_criterion(inputs[0], target, mask))
    ref = _reference(inputs[0], target, mask)
    assert jnp.allclose(loss, ref, atol=1e-5, rtol=1e-5), (loss, ref)

    # bf16 path (native-precision streaming; select/reduce stay in bf16)
    logprobs_bf16 = logprobs.astype(jnp.bfloat16)
    loss_bf = jax.block_until_ready(
        language_model_criterion(logprobs_bf16, target, mask))
    ref_bf = _reference(logprobs_bf16, target, mask)
    assert jnp.allclose(loss_bf, ref_bf, atol=1e-3, rtol=1e-3), (loss_bf, ref_bf)

    print("KERNEL_OK")
</pallas_src>

<mosaic_0001>
module attributes {stable_mosaic.version = 11 : i64} {
  func.func @_nll_kernel(%arg0: i32, %arg1: i32, %arg2: memref<8x32xf32, #tpu.memory_space<vmem>>, %arg3: memref<8x1xi32, #tpu.memory_space<vmem>>, %arg4: memref<8x1xf32, #tpu.memory_space<vmem>>, %arg5: memref<1x8x128xf32, #tpu.memory_space<vmem>>, %arg6: memref<1x8x128xf32, #tpu.memory_space<vmem>>, %arg7: memref<8x1xf32, #tpu.memory_space<vmem>>) attributes {dimension_semantics = [#tpu.dimension_semantics<parallel>, #tpu.dimension_semantics<arbitrary>], iteration_bounds = array<i64: 2, 1>, scalar_prefetch = 0 : i64, scratch_operands = 1 : i64, tpu.core_type = #tpu.core_type<tc>, window_params = [{transform_indices = @transform_0, window_bounds = array<i64: 8, 32>}, {transform_indices = @transform_1, window_bounds = array<i64: 8, 1>}, {transform_indices = @transform_2, window_bounds = array<i64: 8, 1>}, {transform_indices = @transform_3, window_bounds = array<i64: 1, 8, 128>}, {transform_indices = @transform_4, window_bounds = array<i64: 1, 8, 128>}]} {
    %c0_i32 = arith.constant 0 : i32
    %0 = arith.cmpi eq, %arg1, %c0_i32 : i32
    %1 = arith.extui %0 : i1 to i32
    %c0_i32_0 = arith.constant 0 : i32
    %2 = arith.cmpi ne, %1, %c0_i32_0 : i32
    scf.if %2 {
      %cst_11 = arith.constant 0.000000e+00 : f32
      %21 = vector.broadcast %cst_11 : f32 to vector<8x1xf32>
      %c0_12 = arith.constant 0 : index
      %c0_13 = arith.constant 0 : index
      %22 = vector.load %arg7[%c0_12, %c0_13] : memref<8x1xf32, #tpu.memory_space<vmem>>, vector<8x1xf32>
      tpu.vector_store %arg7[%c0_12, %c0_13], %21 {strides = array<i32>} : memref<8x1xf32, #tpu.memory_space<vmem>>, vector<8x1xf32>,
    } else {
    }
    %c0 = arith.constant 0 : index
    %c0_1 = arith.constant 0 : index
    %3 = vector.load %arg2[%c0, %c0_1] : memref<8x32xf32, #tpu.memory_space<vmem>>, vector<8x32xf32>
    %c0_2 = arith.constant 0 : index
    %c0_3 = arith.constant 0 : index
    %4 = vector.load %arg3[%c0_2, %c0_3] : memref<8x1xi32, #tpu.memory_space<vmem>>, vector<8x1xi32>
    %c32_i32 = arith.constant 32 : i32
    %5 = arith.muli %arg1, %c32_i32 : i32
    %6 = vector.broadcast %5 : i32 to vector<8x1xi32>
    %7 = arith.subi %4, %6 : vector<8x1xi32>
    %8 = tpu.iota {dimensions = array<i32: 1>} : vector<8x32xi32>
    %9 = vector.broadcast %7 : vector<8x1xi32> to vector<8x32xi32>
    %10 = arith.cmpi eq, %8, %9 : vector<8x32xi32>
    %cst = arith.constant 0.000000e+00 : f32
    %11 = vector.broadcast %cst : f32 to vector<8x32xf32>
    %12 = arith.select %10, %3, %11 : vector<8x32xi1>, vector<8x32xf32>
    %c0_4 = arith.constant 0 : index
    %c0_5 = arith.constant 0 : index
    %13 = vector.load %arg7[%c0_4, %c0_5] : memref<8x1xf32, #tpu.memory_space<vmem>>, vector<8x1xf32>
    %cst_6 = arith.constant dense<0.000000e+00> : vector<8xf32>
    %14 = vector.multi_reduction <add>, %12, %cst_6 [1] : vector<8x32xf32> to vector<8xf32>
    %15 = vector.shape_cast %14 : vector<8xf32> to vector<8x1xf32>
    %16 = arith.addf %13, %15 : vector<8x1xf32>
    %c0_7 = arith.constant 0 : index
    %c0_8 = arith.constant 0 : index
    %17 = vector.load %arg7[%c0_7, %c0_8] : memref<8x1xf32, #tpu.memory_space<vmem>>, vector<8x1xf32>
    tpu.vector_store %arg7[%c0_7, %c0_8], %16 {strides = array<i32>} : memref<8x1xf32, #tpu.memory_space<vmem>>, vector<8x1xf32>,
    %c0_i32_9 = arith.constant 0 : i32
    %18 = arith.cmpi eq, %arg1, %c0_i32_9 : i32
    %19 = arith.extui %18 : i1 to i32
    %c0_i32_10 = arith.constant 0 : i32
    %20 = arith.cmpi ne, %19, %c0_i32_10 : i32
    scf.if %20 {
      %c0_11 = arith.constant 0 : index
      %c0_12 = arith.constant 0 : index
      %21 = vector.load %arg4[%c0_11, %c0_12] : memref<8x1xf32, #tpu.memory_space<vmem>>, vector<8x1xf32>
      %c8_i32 = arith.constant 8 : i32
      %22 = arith.muli %arg0, %c8_i32 : i32
      %23 = tpu.iota {dimensions = array<i32: 0>} : vector<8x1xi32>
      %24 = vector.broadcast %22 : i32 to vector<8x1xi32>
      %25 = arith.addi %24, %23 : vector<8x1xi32>
      %c16_i32 = arith.constant 16 : i32
      %26 = vector.broadcast %c16_i32 : i32 to vector<8x1xi32>
      %27 = arith.cmpi slt, %25, %26 : vector<8x1xi32>
      %c0_13 = arith.constant 0 : index
      %c0_14 = arith.constant 0 : index
      %28 = vector.load %arg7[%c0_13, %c0_14] : memref<8x1xf32, #tpu.memory_space<vmem>>, vector<8x1xf32>
      %cst_15 = arith.constant 0.000000e+00 : f32
      %29 = vector.broadcast %cst_15 : f32 to vector<8x1xf32>
      %30 = arith.subf %29, %28 : vector<8x1xf32>
      %31 = arith.mulf %30, %21 : vector<8x1xf32>
      %cst_16 = arith.constant 0.000000e+00 : f32
      %32 = vector.broadcast %cst_16 : f32 to vector<8x1xf32>
      %33 = arith.select %27, %31, %32 : vector<8x1xi1>, vector<8x1xf32>
      %34 = vector.shape_cast %33 : vector<8x1xf32> to vector<1x8x1xf32>
      %cst_17 = arith.constant dense<0.000000e+00> : vector<1xf32>
      %35 = vector.multi_reduction <add>, %34, %cst_17 [1, 2] : vector<1x8x1xf32> to vector<1xf32>
      %36 = vector.shape_cast %35 : vector<1xf32> to vector<1x1x1xf32>
      %37 = vector.extract %36[0, 0, 0] : f32 from vector<1x1x1xf32>
      %cst_18 = arith.constant 0.000000e+00 : f32
      %38 = vector.broadcast %cst_18 : f32 to vector<8x1xf32>
      %39 = arith.select %27, %21, %38 : vector<8x1xi1>, vector<8x1xf32>
      %40 = vector.shape_cast %39 : vector<8x1xf32> to vector<1x8x1xf32>
      %cst_19 = arith.constant dense<0.000000e+00> : vector<1xf32>
      %41 = vector.multi_reduction <add>, %40, %cst_19 [1, 2] : vector<1x8x1xf32> to vector<1xf32>
      %42 = vector.shape_cast %41 : vector<1xf32> to vector<1x1x1xf32>
      %43 = vector.extract %42[0, 0, 0] : f32 from vector<1x1x1xf32>
      %44 = vector.broadcast %37 : f32 to vector<1x8x128xf32>
      %c0_20 = arith.constant 0 : index
      %c0_21 = arith.constant 0 : index
      %c0_22 = arith.constant 0 : index
      %45 = vector.load %arg5[%c0_20, %c0_21, %c0_22] : memref<1x8x128xf32, #tpu.memory_space<vmem>>, vector<1x8x128xf32>
      tpu.vector_store %arg5[%c0_20, %c0_21, %c0_22], %44 {strides = array<i32>} : memref<1x8x128xf32, #tpu.memory_space<vmem>>, vector<1x8x128xf32>,
      %46 = vector.broadcast %43 : f32 to vector<1x8x128xf32>
      %c0_23 = arith.constant 0 : index
      %c0_24 = arith.constant 0 : index
      %c0_25 = arith.constant 0 : index
      %47 = vector.load %arg6[%c0_23, %c0_24, %c0_25] : memref<1x8x128xf32, #tpu.memory_space<vmem>>, vector<1x8x128xf32>
      tpu.vector_store %arg6[%c0_23, %c0_24, %c0_25], %46 {strides = array<i32>} : memref<1x8x128xf32, #tpu.memory_space<vmem>>, vector<1x8x128xf32>,
    } else {
    }
    return
  }
  func.func @transform_0(%arg0: i32, %arg1: i32) -> (i32, i32) {
    %c0_i32 = arith.constant 0 : i32
    return %arg0, %arg1 : i32, i32
  }
  func.func @transform_1(%arg0: i32, %arg1: i32) -> (i32, i32) {
    %c0_i32 = arith.constant 0 : i32
    %c0_i32_0 = arith.constant 0 : i32
    return %arg0, %c0_i32 : i32, i32
  }
  func.func @transform_2(%arg0: i32, %arg1: i32) -> (i32, i32) {
    %c0_i32 = arith.constant 0 : i32
    %c0_i32_0 = arith.constant 0 : i32
    return %arg0, %c0_i32 : i32, i32
  }
  func.func @transform_3(%arg0: i32, %arg1: i32) -> (i32, i32, i32) {
    %c0_i32 = arith.constant 0 : i32
    %c0_i32_0 = arith.constant 0 : i32
    %c0_i32_1 = arith.constant 0 : i32
    return %arg0, %c0_i32, %c0_i32_0 : i32, i32, i32
  }
  func.func @transform_4(%arg0: i32, %arg1: i32) -> (i32, i32, i32) {
    %c0_i32 = arith.constant 0 : i32
    %c0_i32_0 = arith.constant 0 : i32
    %c0_i32_1 = arith.constant 0 : i32
    return %arg0, %c0_i32, %c0_i32_0 : i32, i32, i32
  }
}

</mosaic_0001>

<bundles_post_ra>
// kernel: language_model_criterion.1
= control target key start
LH: loop header
LB: loop body
LE: loop exit
PB: predicated region body
PF: predicated region fallthrough
CT: control target
= control target key end

     0   :  { %s540_s15 = smov 0   ;;  %s542_s16 = smov 0   ;;  %s598_s0 = inlined_call_operand.vmem [shape: f32[16,32], index: 0, kind: input, shape index: {}]   ;;  %s599_s1 = inlined_call_operand.vmem [shape: s32[16,1], index: 1, kind: input, shape index: {}]   ;;  %s600_s2 = inlined_call_operand.vmem [shape: f32[16,1], index: 2, kind: input, shape index: {}]   ;;  %s601_s3 = inlined_call_operand.vmem [shape: f32[2,8,128], index: 3, kind: output, shape index: {0}]   ;;  %s602_s4 = inlined_call_operand.vmem [shape: f32[2,8,128], index: 4, kind: output, shape index: {1}]  }
   0x1   :  { %s544_s17 = smov 0  }
   0x2 LB: > { %s27_s18 = sadd.s32 1, %s507_s16  ;;  %p449_p0 = scmp.ge.s32.totalorder %s511_s17, 1  ;;  %s511_s17 = sphi %s544_s17, %s15_s17   ;;  %s507_s16 = sphi %s542_s16, %s604_s16   ;;  %s503_s15 = sphi %s540_s15, %s603_s15  }
   0x3   : > { %p29_p1 = scmp.ge.s32.totalorder %s27_s18, 2  ;;  %p199_p2 = scmp.lt.s32.totalorder %s511_s17, 3 }
   0x5   : > { %s606_s18 = smov (%p29_p1, %s27_s18), 0  ;;  %p200_p3 = pnand %p449_p0, %p199_p2 }
   0x6   : > { %p238_p4 = scmp.lt.s32.totalorder (!%p200_p3), %s503_s15, 1  ;;  %s455_s27 = sshll.u32 (!%p200_p3), %s503_s15, 3 }
   0x7   : > { %203 = sbr.rel (%p200_p3) target bundleno = 504 (0x1f8), region = 32 }
   0xc   : > { %v513_v0 = vmov 0   ;;  %s239_s19 = scalar_select %p238_p4, %s503_s15, 1  ;;  %vm265_vm0 = vcmask 7168   ;;  %v514_v2 = vmov 0.0   ;;  %v272_v3 = vlaneseq }
   0xd   : > { %488 = vset.pattern.permute.xlu0 %v513_v0  ;;  %266 = vst.msk [vmem:[#allocation2] sm:$0xff] %vm265_vm0, %v514_v2  ;;  %vm280_vm1 = vcmask 261120   ;;  %v294_v13 = vstv %s455_s27 }
   0xe   : > { %s562_s20 = sshll.u32 %s239_s19, 3  ;;  %v273_v4 = vand.u32 127, %v272_v3  ;;  %v293_v12 = vshrl.u32 %v272_v3, 7 }
   0xf   : > { %s248_s23 = scalar_lea.vmem %s599_s1, %s562_s20  ;;  %s244_s26 = scalar_lea.vmem %s598_s0, %s562_s20 }
  0x10   : > { %v268_v1 = vld [vmem:[%s248_s23] sm:$0xff]  ;;  %s252_s30 = scalar_lea.vmem %s600_s2, %s562_s20  ;;  %v295_v14 = vadd.s32 %v294_v13, %v293_v12  ;;  %s256_s7 = scalar_lea.vmem %s601_s3, %s562_s20 }
  0x11   : > { %275 = vperm.xlu0 %488, %v268_v1   ;;  %v267_v5 = vld [vmem:[%s244_s26] sm:$0xff]  ;;  %s260_s11 = scalar_lea.vmem %s602_s4, %s562_s20 }
  0x12   : > { %v290_v15 = vld [vmem:[%s252_s30] sm:$0xff]  ;;  %vm296_vm3 = vcmp.lt.s32.totalorder %v295_v14, 16 }
  0x13   : > { %v311_v20 = vsel %vm296_vm3, %v290_v15, 0.0 }
  0x14   : > { %v279_v9 = vld [vmem:[#allocation2] sm:$0xff]  ;;  %v312_v22 = vsel %vm265_vm0, %v311_v20, 0.0 }
  0x8c   : > { %v276_v6 = vpop.permute.xlu0 %275 }
  0x8d   : > { %vm277_vm2 = vcmp.eq.s32.totalorder %v273_v4, %v276_v6 }
  0x8e   : > { %v278_v7 = vsel %vm277_vm2, %v267_v5, 0.0 }
  0x8f   : > { %v281_v8 = vsel %vm280_vm1, %v278_v7, 0.0 }
  0x90   : > { %282 = vadd.xlane.f32.xlu0 %v281_v8 }
 0x119   : > { %v283_v10 = vpop.xlane.xlu0 %282 }
 0x11a   : > { %v284_v11 = vadd.f32 %v283_v10, %v279_v9 }
 0x11c   : > { %286 = vst.msk [vmem:[#allocation2] sm:$0xff] %vm265_vm0, %v284_v11 }
 0x123   : > { %v297_v16 = vld [vmem:[#allocation2] sm:$0xff] }
 0x124   : > { %v298_v17 = vsub.f32 0.0, %v297_v16 }
 0x126   : > { %v299_v18 = vmul.f32 %v298_v17, %v290_v15 }
 0x128   : > { %v300_v19 = vsel %vm296_vm3, %v299_v18, 0.0 }
 0x129   : > { %v301_v21 = vsel %vm265_vm0, %v300_v19, 0.0 }
 0x12a   : > { %302 = vadd.xlane.f32.xlu1 %v301_v21 }
 0x12e   : > { %313 = vadd.xlane.f32.xlu1 %v312_v22 }
 0x1b3   : > { %v303_v23 = vpop.xlane.xlu1 %302 }
 0x1b4   : > { %v304_v24 = vrot.slane %v303_v23, 4 }
 0x1b6   : > { %v305_v25 = vadd.f32 %v304_v24, %v303_v23 }
 0x1b7   : > { %v314_v26 = vpop.xlane.xlu1 %313 }
 0x1b8   : > { %v306_v27 = vrot.slane %v305_v25, 2  ;;  %v315_v28 = vrot.slane %v314_v26, 4 }
 0x1ba   : > { %v316_v29 = vadd.f32 %v315_v28, %v314_v26  ;;  %v307_v30 = vadd.f32 %v306_v27, %v305_v25 }
 0x1bc   : > { %v317_v31 = vrot.slane %v316_v29, 2  ;;  %v308_v32 = vrot.slane %v307_v30, 1 }
 0x1be   : > { %v318_v33 = vadd.f32 %v317_v31, %v316_v29  ;;  %v309_v34 = vadd.f32 %v308_v32, %v307_v30 }
 0x1c0   : > { %458 = vpush %v309_v34  ;;  %v319_v35 = vrot.slane %v318_v33, 1 }
 0x1c2   : > { %v320_v36 = vadd.f32 %v319_v35, %v318_v33 }
 0x1c4   : > { %460 = vpush %v320_v36 }
 0x1f1   : > { %s459_s8 = spop %458 }
 0x1f2   : > { %v322_v37 = vstv %s459_s8 }
 0x1f3   : > { %323 = vst [vmem:[%s256_s7] sm:$0xff] %v322_v37 }
 0x1f5   : > { %s461_s12 = spop %460 }
 0x1f6   : > { %v324_v38 = vstv %s461_s12 }
 0x1f7   : > { %325 = vst [vmem:[%s260_s11] sm:$0xff] %v324_v38 }
 0x1f8 PF: > { %s15_s17 = sadd.s32 1, %s511_s17   ;;  %s603_s15 = smov %s507_s16 }
 0x1f9   : > { %p12_p5 = scmp.ge.s32.totalorder %s15_s17, 4   ;;  %s604_s16 = smov %s606_s18 }
 0x1fb   :  { %14 = sbr.rel (!%p12_p5) target bundleno = 2 (0x2), region = 88 }

</bundles_post_ra>
